<compile_context>
chip_gen: v7x
topology: tpu7x:2x2x1
jax: 0.10.0
libtpu: 0.0.40
codegen_flags: <defaults>
</compile_context>

<pallas_src>
import jax
import jax.numpy as jnp
from jax.experimental import pallas as pl
from jax.experimental.pallas import tpu as pltpu


def mymodel_kernel(x_ref, w1_ref, b1_ref, w2_ref, b2_ref, o_ref):
    # x_ref:  (10, TB)  feature-major batch tile (batch on lanes)
    # w1_ref: (10, 10)  fc1 weight  [out, in]      (grid-invariant)
    # b1_ref: (10, 1)   fc1 bias as a column       (grid-invariant)
    # w2_ref: (5, 10)   fc2 weight  [out, in]      (grid-invariant)
    # b2_ref: (5, 1)    fc2 bias as a column       (grid-invariant)
    # o_ref:  (5, TB)   lane-dense output tile
    x_t = x_ref[...]

    # fc1 in transposed form: h_t[o, b] = sum_i w1[o, i] * x_t[i, b] + b1[o]
    h_t = jnp.dot(w1_ref[...], x_t, preferred_element_type=jnp.float32)
    h_t = h_t + b1_ref[...]

    # flatten(outer(h, h))[:, :10] == h[:, 0:1] * h
    # transposed: y_t = h_t[0:1, :] * h_t  (sublane broadcast of row 0)
    y_t = h_t[0:1, :] * h_t

    # fc2: out_t[o, b] = sum_j w2[o, j] * y_t[j, b] + b2[o]
    out_t = jnp.dot(w2_ref[...], y_t, preferred_element_type=jnp.float32)
    out_t = out_t + b2_ref[...]

    o_ref[...] = out_t.astype(o_ref.dtype)


def _round_up(a, m):
    return (a + m - 1) // m * m


def mymodel_forward(x, w1, b1, w2, b2, *, tb_max=65536):
    """x: (B, 10); w1: (10, 10) [out, in]; b1: (10,); w2: (5, 10); b2: (5,).

    Returns (B, 5), matching MyModel.forward exactly.
    """
    B = x.shape[0]
    LANE = 128

    # Tile cap: multiple of 128 lanes; 65536 rows keeps the double-buffered
    # activation tiles at ~12 MiB (safe on v5e/v6e/v7x).
    tb_max = max(LANE, (tb_max // LANE) * LANE)

    # Batch tile on the LANE axis.  Aim for >= 2 grid steps when B allows it
    # so v7x can shard across both TensorCores (free on v5e/v6e).
    B_ceil = _round_up(B, LANE)
    TB = min(tb_max, max(LANE, _round_up(pl.cdiv(B_ceil, 2), LANE)))
    B_pad = _round_up(B, TB)
    grid = (B_pad // TB,)

    # Feature-major (lane-dense) activations: batch on lanes.  In production
    # the producer should hand x over feature-major (and the consumer take
    # out feature-major) so these transposes fuse away; here they run once
    # in the wrapper to preserve the module's (B, 10) -> (B, 5) interface.
    x_t = x.T                                              # (10, B)
    if B_pad != B:
        x_t = jnp.pad(x_t, ((0, 0), (0, B_pad - B)))       # lane-axis tail pad
    b1c = b1.reshape(10, 1)
    b2c = b2.reshape(5, 1)

    out_t = pl.pallas_call(
        mymodel_kernel,
        out_shape=jax.ShapeDtypeStruct((5, B_pad), jnp.float32),
        grid=grid,
        in_specs=[
            pl.BlockSpec((10, TB), lambda i: (0, i)),      # x_t: tiled over batch lanes
            pl.BlockSpec((10, 10), lambda i: (0, 0)),      # w1: grid-invariant
            pl.BlockSpec((10, 1), lambda i: (0, 0)),       # b1: grid-invariant
            pl.BlockSpec((5, 10), lambda i: (0, 0)),       # w2: grid-invariant
            pl.BlockSpec((5, 1), lambda i: (0, 0)),        # b2: grid-invariant
        ],
        out_specs=pl.BlockSpec((5, TB), lambda i: (0, i)), # lane-dense output
        compiler_params=pltpu.CompilerParams(
            dimension_semantics=("parallel",),             # 2 TCs on v7x
            vmem_limit_bytes=32 * 1024 * 1024,             # < physical VMEM on all gens
        ),
        cost_estimate=pl.CostEstimate(
            flops=2 * B_pad * (10 * 10 + 10 * 5) + B_pad * (10 + 10 + 5),
            transcendentals=0,
            bytes_accessed=4 * (10 * B_pad + 5 * B_pad
                                + w1.size + b1.size + w2.size + b2.size),
        ),
    )(x_t, w1, b1c, w2, b2c)

    # Slice off padded batch columns and restore (B, 5) interface.
    out = out_t[:, :B].T if B_pad != B else out_t.T
    return out


def _reference(x, w1, b1, w2, b2):
    # Pure-JAX reference mirroring the PyTorch forward exactly.
    h = x @ w1.T + b1                                      # (B, 10)
    outer = h[:, :, None] @ h[:, None, :]                  # (B, 10, 10)
    flat = outer.reshape(x.shape[0], -1)                   # (B, 100)
    return flat[:, :10] @ w2.T + b2                        # (B, 5)


if __name__ == "__main__":
    key = jax.random.PRNGKey(0)
    kx, k1, k2, k3, k4, kx2 = jax.random.split(key, 6)

    # Deterministic parameter init (PyTorch-style uniform +-1/sqrt(fan_in)).
    bound1 = 1.0 / jnp.sqrt(10.0)
    w1 = jax.random.uniform(k1, (10, 10), jnp.float32, -bound1, bound1)
    b1 = jax.random.uniform(k2, (10,), jnp.float32, -bound1, bound1)
    bound2 = 1.0 / jnp.sqrt(10.0)
    w2 = jax.random.uniform(k3, (5, 10), jnp.float32, -bound2, bound2)
    b2 = jax.random.uniform(k4, (5,), jnp.float32, -bound2, bound2)

    # Primary small-shape check (B=2, as the module implies).
    B = 2
    x = jax.random.normal(kx, (B, 10), dtype=jnp.float32)
    out = mymodel_forward(x, w1, b1, w2, b2)
    jax.block_until_ready(out)
    ref = _reference(x, w1, b1, w2, b2)
    assert out.shape == (B, 5)
    assert jnp.allclose(out, ref, atol=1e-5, rtol=1e-5)

    # Secondary check exercising the multi-step grid + lane-axis tail padding
    # path (TB=128 -> grid=(3,), B not a multiple of 128).
    B2 = 300
    x2 = jax.random.normal(kx2, (B2, 10), dtype=jnp.float32)
    out2 = mymodel_forward(x2, w1, b1, w2, b2, tb_max=128)
    jax.block_until_ready(out2)
    ref2 = _reference(x2, w1, b1, w2, b2)
    assert out2.shape == (B2, 5)
    assert jnp.allclose(out2, ref2, atol=1e-5, rtol=1e-5)

    print("KERNEL_OK")
</pallas_src>

<mosaic_0001>
module attributes {stable_mosaic.version = 11 : i64} {
  func.func @mymodel_kernel(%arg0: i32, %arg1: memref<10x128xf32, #tpu.memory_space<vmem>>, %arg2: memref<10x10xf32, #tpu.memory_space<vmem>>, %arg3: memref<10x1xf32, #tpu.memory_space<vmem>>, %arg4: memref<5x10xf32, #tpu.memory_space<vmem>>, %arg5: memref<5x1xf32, #tpu.memory_space<vmem>>, %arg6: memref<5x128xf32, #tpu.memory_space<vmem>>) attributes {dimension_semantics = [#tpu.dimension_semantics<parallel>], iteration_bounds = array<i64: 1>, scalar_prefetch = 0 : i64, scratch_operands = 0 : i64, tpu.core_type = #tpu.core_type<tc>, window_params = [{transform_indices = @transform_0, window_bounds = array<i64: 10, 128>}, {pipeline_mode = #tpu.pipeline_mode<synchronous>, transform_indices = @transform_1, window_bounds = array<i64: 10, 10>}, {pipeline_mode = #tpu.pipeline_mode<synchronous>, transform_indices = @transform_2, window_bounds = array<i64: 10, 1>}, {pipeline_mode = #tpu.pipeline_mode<synchronous>, transform_indices = @transform_3, window_bounds = array<i64: 5, 10>}, {pipeline_mode = #tpu.pipeline_mode<synchronous>, transform_indices = @transform_4, window_bounds = array<i64: 5, 1>}, {transform_indices = @transform_5, window_bounds = array<i64: 5, 128>}]} {
    %c0 = arith.constant 0 : index
    %c0_0 = arith.constant 0 : index
    %0 = vector.load %arg1[%c0, %c0_0] : memref<10x128xf32, #tpu.memory_space<vmem>>, vector<10x128xf32>
    %c0_1 = arith.constant 0 : index
    %c0_2 = arith.constant 0 : index
    %1 = vector.load %arg2[%c0_1, %c0_2] : memref<10x10xf32, #tpu.memory_space<vmem>>, vector<10x10xf32>
    %cst = arith.constant dense<0.000000e+00> : vector<10x128xf32>
    %2 = tpu.matmul %1, %0, %cst {dimension_numbers = #tpu.dot_dimension_numbers<[1], [0], [0], [1], [0, 0, 1, 1], [], []>} : vector<10x10xf32>, vector<10x128xf32>, vector<10x128xf32> -> vector<10x128xf32>
    %c0_3 = arith.constant 0 : index
    %c0_4 = arith.constant 0 : index
    %3 = vector.load %arg3[%c0_3, %c0_4] : memref<10x1xf32, #tpu.memory_space<vmem>>, vector<10x1xf32>
    %4 = vector.broadcast %3 : vector<10x1xf32> to vector<10x128xf32>
    %5 = arith.addf %2, %4 : vector<10x128xf32>
    %6 = vector.extract_strided_slice %5 {offsets = [0, 0], sizes = [1, 128], strides = [1, 1]} : vector<10x128xf32> to vector<1x128xf32>
    %7 = vector.broadcast %6 : vector<1x128xf32> to vector<10x128xf32>
    %8 = arith.mulf %7, %5 : vector<10x128xf32>
    %c0_5 = arith.constant 0 : index
    %c0_6 = arith.constant 0 : index
    %9 = vector.load %arg4[%c0_5, %c0_6] : memref<5x10xf32, #tpu.memory_space<vmem>>, vector<5x10xf32>
    %cst_7 = arith.constant dense<0.000000e+00> : vector<5x128xf32>
    %10 = tpu.matmul %9, %8, %cst_7 {dimension_numbers = #tpu.dot_dimension_numbers<[1], [0], [0], [1], [0, 0, 1, 1], [], []>} : vector<5x10xf32>, vector<10x128xf32>, vector<5x128xf32> -> vector<5x128xf32>
    %c0_8 = arith.constant 0 : index
    %c0_9 = arith.constant 0 : index
    %11 = vector.load %arg5[%c0_8, %c0_9] : memref<5x1xf32, #tpu.memory_space<vmem>>, vector<5x1xf32>
    %12 = vector.broadcast %11 : vector<5x1xf32> to vector<5x128xf32>
    %13 = arith.addf %10, %12 : vector<5x128xf32>
    %c0_10 = arith.constant 0 : index
    %c0_11 = arith.constant 0 : index
    %14 = vector.load %arg6[%c0_10, %c0_11] : memref<5x128xf32, #tpu.memory_space<vmem>>, vector<5x128xf32>
    tpu.vector_store %arg6[%c0_10, %c0_11], %13 {strides = array<i32>} : memref<5x128xf32, #tpu.memory_space<vmem>>, vector<5x128xf32>,
    return
  }
  func.func @transform_0(%arg0: i32) -> (i32, i32) {
    %c0_i32 = arith.constant 0 : i32
    %c0_i32_0 = arith.constant 0 : i32
    return %c0_i32, %arg0 : i32, i32
  }
  func.func @transform_1(%arg0: i32) -> (i32, i32) {
    %c0_i32 = arith.constant 0 : i32
    %c0_i32_0 = arith.constant 0 : i32
    %c0_i32_1 = arith.constant 0 : i32
    return %c0_i32, %c0_i32_0 : i32, i32
  }
  func.func @transform_2(%arg0: i32) -> (i32, i32) {
    %c0_i32 = arith.constant 0 : i32
    %c0_i32_0 = arith.constant 0 : i32
    %c0_i32_1 = arith.constant 0 : i32
    return %c0_i32, %c0_i32_0 : i32, i32
  }
  func.func @transform_3(%arg0: i32) -> (i32, i32) {
    %c0_i32 = arith.constant 0 : i32
    %c0_i32_0 = arith.constant 0 : i32
    %c0_i32_1 = arith.constant 0 : i32
    return %c0_i32, %c0_i32_0 : i32, i32
  }
  func.func @transform_4(%arg0: i32) -> (i32, i32) {
    %c0_i32 = arith.constant 0 : i32
    %c0_i32_0 = arith.constant 0 : i32
    %c0_i32_1 = arith.constant 0 : i32
    return %c0_i32, %c0_i32_0 : i32, i32
  }
  func.func @transform_5(%arg0: i32) -> (i32, i32) {
    %c0_i32 = arith.constant 0 : i32
    %c0_i32_0 = arith.constant 0 : i32
    return %c0_i32, %arg0 : i32, i32
  }
}

</mosaic_0001>

<bundles_post_ra>
// kernel: tpu_custom_call.1
= control target key start
LH: loop header
LB: loop body
LE: loop exit
PB: predicated region body
PF: predicated region fallthrough
CT: control target
= control target key end

     0   :  { %10 = vsyncpa [#allocation3], 0  ;;  %s431_s0 = inlined_call_operand.vmem [shape: f32[10,128], index: 0, kind: input, shape index: {}]   ;;  %s432_s1 = inlined_call_operand.hbm [shape: f32[10,10], index: 1, kind: input, shape index: {}]   ;;  %s433_s2 = inlined_call_operand.vmem [shape: f32[10,1], index: 2, kind: input, shape index: {}]   ;;  %s434_s3 = inlined_call_operand.vmem [shape: f32[5,10], index: 3, kind: input, shape index: {}]   ;;  %s435_s4 = inlined_call_operand.vmem [shape: f32[5,1], index: 4, kind: input, shape index: {}]   ;;  %s436_s5 = inlined_call_operand.hbm [shape: f32[5,128], index: 5, kind: output, shape index: {}]  }
   0x1   :  { %11 = vsyncpa [#allocation4], 0  ;;  %s337_s18 = smov [#allocation2]   ;;  %s289_s22 = scalar_lea.hbm %s432_s1, 256 }
   0x2   :  { %s19_s19 = sshll.u32 %s337_s18, 4  ;;  %p290_p0 = scmp.ne.s32.totalorder %s432_s1, %s289_s22  ;;  %s20_s19 = int_to_ptr.vmem [resolvable:$true] %s19_s19 }
   0x3   :  { %p293_p1 = scmp.lt.u32.totalorder %s289_s22, %s432_s1 }
   0x5   :  { %p295_p2 = pnand %p293_p1, %p290_p0 }
   0x7   :  { %298 = shalt.err (!%p295_p2)
}
   0x8   :  { %s299_s27 = scalar_lea.vmem %s20_s19, 256  ;;  %p304_p4 = scmp.lt.s32.totalorder %s20_s19, %s20_s19 }
   0x9   :  { %p300_p3 = scmp.ne.s32.totalorder %s20_s19, %s299_s27  ;;  %p305_p5 = scmp.lt.s32.totalorder %s299_s27, %s299_s27 }
   0xb   :  { %p306_p6 = por %p305_p5, %p304_p4 }
   0xd   :  { %p307_p7 = pnand %p306_p6, %p300_p3 }
   0xf   :  { %310 = shalt.err (!%p307_p7)
}
  0x10   :  { %s338_s28 = smov 128   ;;  %s339_s29 = smov 8  }
  0x11   :  { %25 = dma.hbm_to_vmem [thread:$0]  %s432_s1, 256, %s20_s19, [#allocation3], %s338_s28, %s338_s28, %s339_s29  }
  0x12   :  { %333 = dma.done.wait [#allocation3], 256  }
  0x13   :  { %334 = vsyncadd [#allocation3], 4294967040  ;;  %v340_v0 = vmov 0   ;;  %vm58_vm0 = vcmask 1041408   ;;  %vm51_vm1 = vcmask 80896   ;;  %vm341_vm2 = vmmov 1  }
  0x14   :  { %287 = vset.pattern.permute.xlu0 %v340_v0  ;;  %288 = vset.pattern.permute.xlu1 %v340_v0  ;;  %vm388_vm3 = vmpackc.low %vm58_vm0, %vm341_vm2  ;;  %v35_v2 = vld [vmem:[%s431_s0] sm:$0xff]  ;;  %v36_v3 = vld [vmem:[%s431_s0 + $0x8] sm:$0x3]  ;;  %v342_v9 = vmov 0.0|0.0   ;;  %vm343_vm4 = vmmov 0   ;;  %v344_v10 = vmov 0.0   ;;  %v137_v12 = vlaneseq }
  0x15   :  { %v37_v4 = vld [vmem:[#allocation2] sm:$0xff]  ;;  %v268_v5 = vpack.c.bf16 %v36_v3, %v35_v2  ;;  %v40_v7 = vld [vmem:[%s433_s2 + $0x8] sm:$0x3]  ;;  %274 = vmatprep.subr.bf16.mxu1 %v342_v9  ;;  %265 = vmatprep.mubr.msk.f32.mxu1 %vm343_vm4, %v344_v10 }
  0x16   :  { %258 = vmatprep.mubr.msk.f32.mxu0 %vm51_vm1, %v37_v4  ;;  %v39_v6 = vld [vmem:[%s433_s2] sm:$0xff]  ;;  %v38_v8 = vld [vmem:[#allocation2 + $0x8] sm:$0x3]  ;;  %v138_v14 = vshrl.u32 %v137_v12, 7 }
  0x17   :  { %43 = vperm.xlu0 %287, %v39_v6   ;;  %270 = vmatprep.subr.msk.bf16.mxu0 %vm388_vm3, %v268_v5  ;;  %v144_v11 = vld [vmem:[%s435_s4] sm:$0x1f]  ;;  %s345_s4 = smov [#allocation5]  }
  0x18   :  { %273 = vmatpush3.bf16.msk.msra.mxu0 %vm388_vm3, %v268_v5  ;;  %147 = vperm.xlu1 %288, %v144_v11   ;;  %v139_v16 = vsub.s32 0, %v138_v14  ;;  %v143_v25 = vld [vmem:[%s434_s3] sm:$0x1f]  ;;  %s233_s16 = sshll.u32 %s345_s4, 4  ;;  %s234_s16 = int_to_ptr.vmem [resolvable:$true] %s233_s16 }
  0x19   :  { %s311_s17 = scalar_lea.vmem %s234_s16, 128  ;;  %p316_p9 = scmp.lt.s32.totalorder %s234_s16, %s234_s16 }
  0x1a   :  { %p312_p8 = scmp.ne.s32.totalorder %s234_s16, %s311_s17  ;;  %p317_p10 = scmp.lt.s32.totalorder %s311_s17, %s311_s17 }
  0x1b   :  { %48 = vperm.xlu0 %287, %v40_v7   ;;  %259 = vmatmul.mubr.msk.f32.vlgmr.msra.gmra.mrb[0].mxu0 %vm51_vm1, %v38_v8 }
  0x1c   :  { %p318_p11 = por %p317_p10, %p316_p9 }
  0x1e   :  { %p319_p12 = pnand %p318_p11, %p312_p8 }
  0x96   :  { %v44_v13 = vpop.permute.xlu0 %43 }
  0x97   :  { %v148_v26 = vpop.permute.xlu1 %147 }
  0x9a   :  { %v49_v17 = vpop.permute.xlu0 %48 }
  0xee   :  { %v260_v15 = vpop.f32.mrb[0].mxu0 }
  0xef   :  { %v128_v18 = vpop.f32.mrb[1].mxu0  ;;  %v134_v20 = vadd.f32 %v260_v15, %v49_v17 }
  0xf0   :  { %v129_v19 = vadd.f32 %v128_v18, %v44_v13 }
  0xf2   :  { %v140_v21 = vrot.slane %v129_v19, %v139_v16 }
  0xf4   :  { %v141_v22 = vmul.f32 %v140_v21, %v129_v19  ;;  %v142_v23 = vmul.f32 %v140_v21, %v134_v20 }
  0xf6   :  { %v275_v24 = vpack.c.bf16 %v142_v23, %v141_v22 }
  0xf8   :  { %277 = vmatpush3.bf16.msk.msra.mxu1 %vm388_vm3, %v275_v24 }
  0xfb   :  { %266 = vmatmul.mubr.msk.f32.vlgmr.msra.gmra.mrb[0].mxu1 %vm51_vm1, %v143_v25 }
 0x1ce   :  { %v222_v27 = vpop.f32.mrb[0].mxu1 }
 0x1cf   :  { %v223_v28 = vadd.f32 %v222_v27, %v148_v26  ;;  %v267_v29 = vpop.f32.mrb[1].mxu1 }
 0x1d1   :  { %226 = vst [vmem:[#allocation5] sm:$0x1f] %v223_v28 }
 0x1d2   :  { %322 = shalt.err (!%p319_p12)
}
 0x1d3   :  { %s323_s3 = scalar_lea.hbm %s436_s5, 128 }
 0x1d4   :  { %p324_p13 = scmp.ne.s32.totalorder %s436_s5, %s323_s3  ;;  %p327_p0 = scmp.lt.u32.totalorder %s323_s3, %s436_s5 }
 0x1d6   :  { %p329_p1 = pnand %p327_p0, %p324_p13 }
 0x1d8   :  { %332 = shalt.err (!%p329_p1)
}
 0x1d9   :  { %236 = dma.vmem_to_hbm [thread:$0]  %s234_s16, 128, %s436_s5, [#allocation4]  }
 0x1da   :  { %335 = dma.done.wait [#allocation4], 128  }
 0x1db   :  { %336 = vsyncadd [#allocation4], 4294967168 }
 0x1dc   :  { %240 = vsyncpa [#allocation3], 1 }
 0x1dd   :  { %241 = vsyncpa [#allocation4], 1 }

</bundles_post_ra>
